<compile_context>
chip_gen: v5e
topology: v5e:2x2
jax: 0.10.0
libtpu: 0.0.40
codegen_flags: <defaults>
</compile_context>

<pallas_src>
import functools

import jax
import jax.numpy as jnp
from jax import lax
from jax.experimental import pallas as pl
from jax.experimental.pallas import tpu as pltpu


def _apply_activation(name, g):
    if name == "relu":
        return jnp.maximum(g, 0.0)
    if name == "gelu":
        return jax.nn.gelu(g)
    if name == "silu":
        return g * jax.nn.sigmoid(g)
    if name == "sigmoid":
        return jax.nn.sigmoid(g)
    if name == "bilinear":     # bilinear GLU: no nonlinearity on the gate branch
        return g
    raise ValueError(f"unknown activation {name}")


def _largest_divisor_le(n, cap):
    cap = max(1, min(cap, n))
    for d in range(cap, 0, -1):
        if n % d == 0:
            return d
    return 1


def _device_config():
    """Generation-aware (token_tile, eh_tile, vmem_limit_bytes)."""
    kind = ""
    try:
        kind = jax.devices()[0].device_kind.lower()
    except Exception:
        pass
    vmem_cap = 128 * 1024 * 1024
    try:
        vmem_cap = int(pltpu.get_tpu_info().vmem_capacity_bytes)
    except Exception:
        pass
    if ("v5 lite" in kind) or ("v5e" in kind) or ("v5lite" in kind):
        # v5e: 4x 128x128 MXU -> 128 rows already fill a pass; spend the big
        # 128 MiB VMEM on larger weight chunks instead of larger token tiles.
        tn, eh = 128, 1024
    elif vmem_cap <= 64 * 1024 * 1024:
        # v7x-class: 256x256 MXU but only 64 MiB VMEM -> keep eh chunks modest.
        tn, eh = 256, 512
    else:
        # v6e-class: 256x256 MXU, 128 MiB VMEM.
        tn, eh = 256, 1024
    vmem_limit = max(32 * 1024 * 1024,
                     min(int(vmem_cap * 0.82), vmem_cap - 8 * 1024 * 1024))
    return tn, eh, vmem_limit


def prepare_moe_weights(params, *, eh_tile=None, compute_dtype=jnp.bfloat16):
    """One-time weight preprocessing (hoisted out of the forward pass).

    Fuses gate+up into a single lane-dense [H, 2*eh_t] matmul operand, chunks the
    expert hidden dim, and casts to the MXU compute dtype.
    """
    wg = params["w_gate_proj"]    # [E, H, Eh]
    wu = params["w_up_proj"]      # [E, H, Eh]
    wd = params["w_down_proj"]    # [E, Eh, H]
    E, H, Eh = wg.shape
    if eh_tile is None:
        eh_tile = _device_config()[1]
    eh_t = _largest_divisor_le(Eh, eh_tile)
    n_c = Eh // eh_t
    wg4 = wg.reshape(E, H, n_c, eh_t).transpose(0, 2, 1, 3)          # [E, n_c, H, eh_t]
    wu4 = wu.reshape(E, H, n_c, eh_t).transpose(0, 2, 1, 3)
    wgu = jnp.concatenate([wg4, wu4], axis=-1).astype(compute_dtype)  # [E, n_c, H, 2*eh_t]
    wd4 = wd.reshape(E, n_c, eh_t, H).astype(compute_dtype)           # [E, n_c, eh_t, H]
    return {"wgu": wgu, "wd": wd4, "eh_tile": eh_t, "num_chunks": n_c,
            "num_experts": E, "hidden": H, "compute_dtype": compute_dtype}


def _moe_glu_kernel(activation_type, eh_tile, num_experts, compute_dtype,
                    # scalar prefetch (SMEM)
                    slot_e_ref, slot_a_ref, fetch_e_ref, fetch_c_ref,
                    # inputs
                    x_ref, base_ref, route_ref, wgu_ref, wd_ref,
                    # output (also the f32 accumulator; resident across s/c)
                    o_ref):
    """Grid = (token_tiles, expert_slots, eh_chunks); slots & chunks are reductions."""
    i = pl.program_id(0)
    s = pl.program_id(1)
    c = pl.program_id(2)

    # Initialize the resident output block with the precomputed LoRA term
    # (fused epilogue: no separate N*H add pass in XLA afterwards).
    @pl.when((s == 0) & (c == 0))
    def _():
        o_ref[...] = base_ref[...]

    slot = i * num_experts + s
    active = slot_a_ref[slot] > 0

    # Compute only for active (tile, expert) slots; the weight DMAs for inactive
    # slots are already elided because their block indices repeat (see wrapper).
    @pl.when(active)
    def _():
        e_id = slot_e_ref[slot]
        x = x_ref[...]                                                  # (TN, H) bf16
        # Fused, lane-dense gate+up matmul: (TN, H) @ (H, 2*eh_t) on the MXU.
        gu = jnp.dot(x, wgu_ref[...], preferred_element_type=jnp.float32)
        g = gu[:, :eh_tile]
        u = gu[:, eh_tile:]
        h = _apply_activation(activation_type, g) * u                   # f32 (VPU/EUP)
        # Select this slot's routing-weight column from the resident (TN, E_pad)
        # block with a lane iota + reduce (cheap XLU work, no per-expert DMA).
        lane = lax.broadcasted_iota(jnp.int32, route_ref.shape, 1)
        w = jnp.sum(jnp.where(lane == e_id, route_ref[...], 0.0),
                    axis=1, keepdims=True)                              # (TN, 1) f32
        # Scale BEFORE the down projection (H/eh_t less VALU work; linear => same).
        h = (h * w).astype(compute_dtype)
        o_ref[...] += jnp.dot(h, wd_ref[...], preferred_element_type=jnp.float32)


def sparse_mlp_with_lora_forward(x, params, *, activation_type="silu",
                                 moe_topk=1, lora_rank=0, lora_alpha=None,
                                 lora_dropout_rate=0.0, lora_dropout_seed=42,
                                 token_tile=None, eh_tile=None,
                                 compute_dtype=jnp.bfloat16, prepared=None):
    B, S, H = x.shape
    N = B * S
    xf = x.reshape(N, H).astype(jnp.float32)

    tn_cfg, eh_cfg, vmem_limit = _device_config()
    if token_tile is None:
        token_tile = tn_cfg
    if eh_tile is None:
        eh_tile = eh_cfg

    if prepared is None:
        prepared = prepare_moe_weights(params, eh_tile=eh_tile,
                                       compute_dtype=compute_dtype)
    wgu = prepared["wgu"]
    wd4 = prepared["wd"]
    eh_t = prepared["eh_tile"]
    n_c = prepared["num_chunks"]
    E = prepared["num_experts"]
    compute_dtype = prepared["compute_dtype"]

    # ---- gating / top-k routing (tiny; plain XLA in f32) ----
    w_gate = params["gate"].astype(jnp.float32)                      # [H, E]
    probs = jax.nn.softmax(xf @ w_gate, axis=-1)                     # [N, E]
    topv, topi = lax.top_k(probs, moe_topk)
    topv = topv / jnp.sum(topv, axis=-1, keepdims=True)              # renormalize top-k
    route = jnp.zeros((N, E), jnp.float32)
    route = route.at[jnp.arange(N)[:, None], topi].set(topv)         # dense [N, E]

    # ---- LoRA term precomputed in XLA (rank-r matmuls), fused as accumulator init ----
    if lora_rank > 0:
        la = params["lora_A"].astype(jnp.float32)                    # [H, r]
        lb = params["lora_B"].astype(jnp.float32)                    # [r, H]
        alpha = lora_rank if lora_alpha is None else lora_alpha
        scaling = float(alpha) / float(lora_rank)
        if lora_dropout_rate > 0.0:
            # TODO(synk): torch-exact dropout RNG stream is not reproducible in JAX;
            # a jax.random bernoulli mask with lora_dropout_seed is used instead.
            keep = jax.random.bernoulli(jax.random.PRNGKey(lora_dropout_seed),
                                        1.0 - lora_dropout_rate, xf.shape)
            xl = jnp.where(keep, xf / (1.0 - lora_dropout_rate), 0.0)
        else:
            xl = xf
        base = scaling * (xl @ la) @ lb                              # [N, H] f32
    else:
        base = jnp.zeros((N, H), jnp.float32)

    # ---- pad tokens to a multiple of the token tile ----
    TN = token_tile
    if N < TN:                       # tiny calls: shrink TN instead of huge padding
        TN = max(8, -(-N // 8) * 8)
    n_tiles = -(-N // TN)
    N_pad = n_tiles * TN
    pad = N_pad - N
    x_k = xf.astype(compute_dtype)
    if pad:
        x_k = jnp.pad(x_k, ((0, pad), (0, 0)))
        base = jnp.pad(base, ((0, pad), (0, 0)))
        route_p = jnp.pad(route, ((0, pad), (0, 0)))
    else:
        route_p = route

    # resident per-tile routing block: pad expert dim to lane width (zeros)
    E_pad = max(128, -(-E // 128) * 128)
    route_blk = jnp.pad(route_p, ((0, 0), (0, E_pad - E)))           # [N_pad, E_pad]

    # ---- per-tile active-expert compaction (scalar prefetch, SMEM) ----
    tile_mask = (route_p.reshape(n_tiles, TN, E) > 0.0).any(axis=1)  # (n_tiles, E)
    cnt = tile_mask.sum(axis=1).astype(jnp.int32)                    # (n_tiles,)
    order = jnp.argsort(jnp.logical_not(tile_mask).astype(jnp.int32),
                        axis=1, stable=True).astype(jnp.int32)       # active experts first
    slot_expert = order.reshape(-1)                                  # (n_tiles*E,)
    slot_active = (jnp.arange(E, dtype=jnp.int32)[None, :] <
                   cnt[:, None]).astype(jnp.int32).reshape(-1)       # (n_tiles*E,)

    # Forward-filled weight-fetch block indices over the flattened grid order
    # (i, s, c) with c fastest: inactive slots repeat the previously fetched
    # (expert, chunk) block index, so Pallas elides their weight DMAs entirely.
    des_e = jnp.repeat(slot_expert, n_c)
    des_c = jnp.tile(jnp.arange(n_c, dtype=jnp.int32), n_tiles * E)
    valid = jnp.repeat(slot_active, n_c) > 0
    step_idx = jnp.arange(n_tiles * E * n_c, dtype=jnp.int32)
    last = jnp.maximum(lax.cummax(jnp.where(valid, step_idx, -1), axis=0), 0)
    fetch_e = des_e[last].astype(jnp.int32)
    fetch_c = des_c[last].astype(jnp.int32)

    kernel = functools.partial(_moe_glu_kernel, activation_type, eh_t, E,
                               compute_dtype)

    def _tile_index(i, s, c, se, sa, fe, fc):
        return (i, 0)

    def _route_index(i, s, c, se, sa, fe, fc):
        return (i, 0)

    def _w_index(i, s, c, se, sa, fe, fc):
        t = (i * E + s) * n_c + c
        return (fe[t], fc[t], 0, 0)

    moe = pl.pallas_call(
        kernel,
        out_shape=jax.ShapeDtypeStruct((N_pad, H), jnp.float32),
        grid_spec=pltpu.PrefetchScalarGridSpec(
            num_scalar_prefetch=4,
            grid=(n_tiles, E, n_c),
            in_specs=[
                # x tokens (bf16), resident across the slot/chunk reduction axes
                pl.BlockSpec((TN, H), _tile_index),
                # LoRA base term (f32), read once per tile at accumulator init
                pl.BlockSpec((TN, H), _tile_index),
                # routing weights: ONE resident (TN, E_pad) block per tile
                pl.BlockSpec((TN, E_pad), _route_index),
                # fused gate+up weight chunk: (H, 2*eh_t), active-slot indices only
                pl.BlockSpec((pl.Squeezed(), pl.Squeezed(), H, 2 * eh_t), _w_index),
                # down projection chunk: (eh_t, H), active-slot indices only
                pl.BlockSpec((pl.Squeezed(), pl.Squeezed(), eh_t, H), _w_index),
            ],
            # f32 output doubles as the accumulator (no separate VMEM scratch)
            out_specs=pl.BlockSpec((TN, H), _tile_index),
        ),
        compiler_params=pltpu.CompilerParams(
            dimension_semantics=("parallel", "arbitrary", "arbitrary"),
            vmem_limit_bytes=vmem_limit),
    )(slot_expert, slot_active, fetch_e, fetch_c,
      x_k, base, route_blk, wgu, wd4)

    out = moe[:N]
    return out.reshape(B, S, H).astype(x.dtype)


def reference_forward(x, params, *, activation_type="silu", moe_topk=1,
                      lora_rank=0, lora_alpha=None):
    """Pure-JAX f32 reference of the module semantics (no dropout)."""
    B, S, H = x.shape
    N = B * S
    xf = x.reshape(N, H).astype(jnp.float32)
    w_gate = params["gate"].astype(jnp.float32)
    wg, wu, wd = params["w_gate_proj"], params["w_up_proj"], params["w_down_proj"]
    E = wg.shape[0]

    probs = jax.nn.softmax(xf @ w_gate, axis=-1)
    topv, topi = lax.top_k(probs, moe_topk)
    topv = topv / jnp.sum(topv, axis=-1, keepdims=True)
    route = jnp.zeros((N, E), jnp.float32).at[jnp.arange(N)[:, None], topi].set(topv)

    out = jnp.zeros((N, H), jnp.float32)
    for e in range(E):
        g = xf @ wg[e].astype(jnp.float32)
        u = xf @ wu[e].astype(jnp.float32)
        h = _apply_activation(activation_type, g) * u
        y = h @ wd[e].astype(jnp.float32)
        out = out + route[:, e:e + 1] * y

    if lora_rank > 0:
        alpha = lora_rank if lora_alpha is None else lora_alpha
        out = out + (alpha / lora_rank) * (xf @ params["lora_A"].astype(jnp.float32)) \
                    @ params["lora_B"].astype(jnp.float32)
    return out.reshape(B, S, H).astype(x.dtype)


if __name__ == "__main__":
    # Small shapes consistent with the module.
    batch_size, seq_len, hidden_size = 2, 8, 128
    ffh_size, num_experts, moe_topk = 256, 4, 2
    expert_size = ffh_size // num_experts
    lora_rank, lora_alpha = 8, 16.0
    init_mean, init_std = 0.0, 0.02

    key = jax.random.PRNGKey(0)
    k_gate, k_g, k_u, k_d, k_la, k_lb, k_x = jax.random.split(key, 7)

    # TODO(synk): torch-exact RNG for reset_parameters is not reproducible in JAX;
    # parameters are initialized deterministically with jax.random instead.
    params = {
        "gate": init_mean + init_std * jax.random.normal(
            k_gate, (hidden_size, num_experts), jnp.float32),
        "w_gate_proj": init_mean + init_std * jax.random.normal(
            k_g, (num_experts, hidden_size, expert_size), jnp.float32),
        "w_up_proj": init_mean + init_std * jax.random.normal(
            k_u, (num_experts, hidden_size, expert_size), jnp.float32),
        "w_down_proj": init_mean + init_std * jax.random.normal(
            k_d, (num_experts, expert_size, hidden_size), jnp.float32),
        "lora_A": init_std * jax.random.normal(
            k_la, (hidden_size, lora_rank), jnp.float32),
        "lora_B": init_std * jax.random.normal(
            k_lb, (lora_rank, hidden_size), jnp.float32),
    }

    x = jax.random.normal(k_x, (batch_size, seq_len, hidden_size), jnp.float32)

    # One-time weight preprocessing (hoisted out of the per-call forward path).
    prepared = prepare_moe_weights(params, compute_dtype=jnp.bfloat16)

    out = sparse_mlp_with_lora_forward(
        x, params, activation_type="silu", moe_topk=moe_topk,
        lora_rank=lora_rank, lora_alpha=lora_alpha,
        lora_dropout_rate=0.0, compute_dtype=jnp.bfloat16, prepared=prepared)
    out = jax.block_until_ready(out)

    ref = reference_forward(
        x, params, activation_type="silu", moe_topk=moe_topk,
        lora_rank=lora_rank, lora_alpha=lora_alpha)

    assert out.shape == (batch_size, seq_len, hidden_size)
    # NOTE: bf16 MXU feeds with f32 accumulation; at production hidden sizes this
    # absolute tolerance should be loosened (or made relative) as error ~ sqrt(K)*eps.
    max_err = float(jnp.max(jnp.abs(out.astype(jnp.float32) - ref.astype(jnp.float32))))
    assert max_err < 3e-3, f"mismatch vs reference: max abs err {max_err}"

    print("KERNEL_OK")
</pallas_src>

<mosaic_0001>
module attributes {stable_mosaic.version = 11 : i64} {
  func.func @_moe_glu_kernel(%arg0: i32, %arg1: i32, %arg2: i32, %arg3: memref<4xi32, #tpu.memory_space<smem>>, %arg4: memref<4xi32, #tpu.memory_space<smem>>, %arg5: memref<4xi32, #tpu.memory_space<smem>>, %arg6: memref<4xi32, #tpu.memory_space<smem>>, %arg7: memref<16x128xbf16, #tpu.memory_space<vmem>>, %arg8: memref<16x128xf32, #tpu.memory_space<vmem>>, %arg9: memref<16x128xf32, #tpu.memory_space<vmem>>, %arg10: memref<1x1x128x128xbf16, #tpu.memory_space<vmem>>, %arg11: memref<1x1x64x128xbf16, #tpu.memory_space<vmem>>, %arg12: memref<16x128xf32, #tpu.memory_space<vmem>>) attributes {dimension_semantics = [#tpu.dimension_semantics<parallel>, #tpu.dimension_semantics<arbitrary>, #tpu.dimension_semantics<arbitrary>], iteration_bounds = array<i64: 1, 4, 1>, scalar_prefetch = 4 : i64, scratch_operands = 0 : i64, tpu.core_type = #tpu.core_type<tc>, window_params = [{transform_indices = @transform_0, window_bounds = array<i64: 16, 128>}, {transform_indices = @transform_1, window_bounds = array<i64: 16, 128>}, {transform_indices = @transform_2, window_bounds = array<i64: 16, 128>}, {transform_indices = @transform_3, window_bounds = array<i64: 1, 1, 128, 128>}, {transform_indices = @transform_4, window_bounds = array<i64: 1, 1, 64, 128>}, {transform_indices = @transform_5, window_bounds = array<i64: 16, 128>}]} {
    %c0_i32 = arith.constant 0 : i32
    %0 = arith.cmpi eq, %arg1, %c0_i32 : i32
    %c0_i32_0 = arith.constant 0 : i32
    %1 = arith.cmpi eq, %arg2, %c0_i32_0 : i32
    %2 = arith.andi %0, %1 : i1
    %3 = arith.extui %2 : i1 to i32
    %c0_i32_1 = arith.constant 0 : i32
    %4 = arith.cmpi ne, %3, %c0_i32_1 : i32
    scf.if %4 {
      %c0 = arith.constant 0 : index
      %c0_4 = arith.constant 0 : index
      %12 = vector.load %arg8[%c0, %c0_4] : memref<16x128xf32, #tpu.memory_space<vmem>>, vector<16x128xf32>
      %c0_5 = arith.constant 0 : index
      %c0_6 = arith.constant 0 : index
      %13 = vector.load %arg12[%c0_5, %c0_6] : memref<16x128xf32, #tpu.memory_space<vmem>>, vector<16x128xf32>
      tpu.vector_store %arg12[%c0_5, %c0_6], %12 {strides = array<i32>} : memref<16x128xf32, #tpu.memory_space<vmem>>, vector<16x128xf32>,
    } else {
    }
    %c4_i32 = arith.constant 4 : i32
    %5 = arith.muli %arg0, %c4_i32 : i32
    %6 = arith.addi %5, %arg1 : i32
    %7 = arith.index_cast %6 : i32 to index
    %8 = memref.load %arg4[%7] : memref<4xi32, #tpu.memory_space<smem>>
    %c0_i32_2 = arith.constant 0 : i32
    %9 = arith.cmpi sgt, %8, %c0_i32_2 : i32
    %10 = arith.extui %9 : i1 to i32
    %c0_i32_3 = arith.constant 0 : i32
    %11 = arith.cmpi ne, %10, %c0_i32_3 : i32
    scf.if %11 {
      %12 = arith.index_cast %6 : i32 to index
      %13 = memref.load %arg3[%12] : memref<4xi32, #tpu.memory_space<smem>>
      %c0 = arith.constant 0 : index
      %c0_4 = arith.constant 0 : index
      %14 = vector.load %arg7[%c0, %c0_4] : memref<16x128xbf16, #tpu.memory_space<vmem>>, vector<16x128xbf16>
      %c0_5 = arith.constant 0 : index
      %c0_6 = arith.constant 0 : index
      %c0_7 = arith.constant 0 : index
      %c0_8 = arith.constant 0 : index
      %15 = vector.load %arg10[%c0_5, %c0_6, %c0_7, %c0_8] : memref<1x1x128x128xbf16, #tpu.memory_space<vmem>>, vector<1x1x128x128xbf16>
      %16 = vector.shape_cast %15 : vector<1x1x128x128xbf16> to vector<128x128xbf16>
      %cst = arith.constant dense<0.000000e+00> : vector<16x128xf32>
      %17 = tpu.matmul %14, %16, %cst {dimension_numbers = #tpu.dot_dimension_numbers<[1], [0], [0], [1], [0, 0, 1, 1], [], []>} : vector<16x128xbf16>, vector<128x128xbf16>, vector<16x128xf32> -> vector<16x128xf32>
      %18 = vector.extract_strided_slice %17 {offsets = [0, 0], sizes = [16, 64], strides = [1, 1]} : vector<16x128xf32> to vector<16x64xf32>
      %19 = vector.extract_strided_slice %17 {offsets = [0, 64], sizes = [16, 64], strides = [1, 1]} : vector<16x128xf32> to vector<16x64xf32>
      %20 = arith.negf %18 : vector<16x64xf32>
      %21 = math.exp %20 : vector<16x64xf32>
      %cst_9 = arith.constant 1.000000e+00 : f32
      %22 = vector.broadcast %cst_9 : f32 to vector<16x64xf32>
      %23 = arith.addf %22, %21 : vector<16x64xf32>
      %24 = arith.divf %22, %23 : vector<16x64xf32>
      %25 = arith.mulf %18, %24 : vector<16x64xf32>
      %26 = arith.mulf %25, %19 : vector<16x64xf32>
      %27 = tpu.iota {dimensions = array<i32: 1>} : vector<16x128xi32>
      %28 = vector.broadcast %13 : i32 to vector<16x128xi32>
      %29 = arith.cmpi eq, %27, %28 : vector<16x128xi32>
      %c0_10 = arith.constant 0 : index
      %c0_11 = arith.constant 0 : index
      %30 = vector.load %arg9[%c0_10, %c0_11] : memref<16x128xf32, #tpu.memory_space<vmem>>, vector<16x128xf32>
      %cst_12 = arith.constant 0.000000e+00 : f32
      %31 = vector.broadcast %cst_12 : f32 to vector<16x128xf32>
      %32 = arith.select %29, %30, %31 : vector<16x128xi1>, vector<16x128xf32>
      %cst_13 = arith.constant dense<0.000000e+00> : vector<16xf32>
      %33 = vector.multi_reduction <add>, %32, %cst_13 [1] : vector<16x128xf32> to vector<16xf32>
      %34 = vector.shape_cast %33 : vector<16xf32> to vector<16x1xf32>
      %35 = vector.broadcast %34 : vector<16x1xf32> to vector<16x64xf32>
      %36 = arith.mulf %26, %35 : vector<16x64xf32>
      %37 = arith.truncf %36 : vector<16x64xf32> to vector<16x64xbf16>
      %c0_14 = arith.constant 0 : index
      %c0_15 = arith.constant 0 : index
      %38 = vector.load %arg12[%c0_14, %c0_15] : memref<16x128xf32, #tpu.memory_space<vmem>>, vector<16x128xf32>
      %c0_16 = arith.constant 0 : index
      %c0_17 = arith.constant 0 : index
      %c0_18 = arith.constant 0 : index
      %c0_19 = arith.constant 0 : index
      %39 = vector.load %arg11[%c0_16, %c0_17, %c0_18, %c0_19] : memref<1x1x64x128xbf16, #tpu.memory_space<vmem>>, vector<1x1x64x128xbf16>
      %40 = vector.shape_cast %39 : vector<1x1x64x128xbf16> to vector<64x128xbf16>
      %cst_20 = arith.constant dense<0.000000e+00> : vector<16x128xf32>
      %41 = tpu.matmul %37, %40, %cst_20 {dimension_numbers = #tpu.dot_dimension_numbers<[1], [0], [0], [1], [0, 0, 1, 1], [], []>} : vector<16x64xbf16>, vector<64x128xbf16>, vector<16x128xf32> -> vector<16x128xf32>
      %42 = arith.addf %38, %41 : vector<16x128xf32>
      %c0_21 = arith.constant 0 : index
      %c0_22 = arith.constant 0 : index
      %43 = vector.load %arg12[%c0_21, %c0_22] : memref<16x128xf32, #tpu.memory_space<vmem>>, vector<16x128xf32>
      tpu.vector_store %arg12[%c0_21, %c0_22], %42 {strides = array<i32>} : memref<16x128xf32, #tpu.memory_space<vmem>>, vector<16x128xf32>,
    } else {
    }
    return
  }
  func.func @transform_0(%arg0: i32, %arg1: i32, %arg2: i32, %arg3: memref<4xi32, #tpu.memory_space<smem>>, %arg4: memref<4xi32, #tpu.memory_space<smem>>, %arg5: memref<4xi32, #tpu.memory_space<smem>>, %arg6: memref<4xi32, #tpu.memory_space<smem>>) -> (i32, i32) {
    %c0_i32 = arith.constant 0 : i32
    %c0_i32_0 = arith.constant 0 : i32
    return %arg0, %c0_i32 : i32, i32
  }
  func.func @transform_1(%arg0: i32, %arg1: i32, %arg2: i32, %arg3: memref<4xi32, #tpu.memory_space<smem>>, %arg4: memref<4xi32, #tpu.memory_space<smem>>, %arg5: memref<4xi32, #tpu.memory_space<smem>>, %arg6: memref<4xi32, #tpu.memory_space<smem>>) -> (i32, i32) {
    %c0_i32 = arith.constant 0 : i32
    %c0_i32_0 = arith.constant 0 : i32
    return %arg0, %c0_i32 : i32, i32
  }
  func.func @transform_2(%arg0: i32, %arg1: i32, %arg2: i32, %arg3: memref<4xi32, #tpu.memory_space<smem>>, %arg4: memref<4xi32, #tpu.memory_space<smem>>, %arg5: memref<4xi32, #tpu.memory_space<smem>>, %arg6: memref<4xi32, #tpu.memory_space<smem>>) -> (i32, i32) {
    %c0_i32 = arith.constant 0 : i32
    %c0_i32_0 = arith.constant 0 : i32
    return %arg0, %c0_i32 : i32, i32
  }
  func.func @transform_3(%arg0: i32, %arg1: i32, %arg2: i32, %arg3: memref<4xi32, #tpu.memory_space<smem>>, %arg4: memref<4xi32, #tpu.memory_space<smem>>, %arg5: memref<4xi32, #tpu.memory_space<smem>>, %arg6: memref<4xi32, #tpu.memory_space<smem>>) -> (i32, i32, i32, i32) {
    %c4_i32 = arith.constant 4 : i32
    %0 = arith.muli %arg0, %c4_i32 : i32
    %1 = arith.addi %0, %arg1 : i32
    %c1_i32 = arith.constant 1 : i32
    %2 = arith.muli %1, %c1_i32 : i32
    %3 = arith.addi %2, %arg2 : i32
    %4 = arith.index_cast %3 : i32 to index
    %5 = memref.load %arg5[%4] : memref<4xi32, #tpu.memory_space<smem>>
    %6 = arith.index_cast %3 : i32 to index
    %7 = memref.load %arg6[%6] : memref<4xi32, #tpu.memory_space<smem>>
    %c0_i32 = arith.constant 0 : i32
    %c0_i32_0 = arith.constant 0 : i32
    %c0_i32_1 = arith.constant 0 : i32
    return %5, %7, %c0_i32, %c0_i32_0 : i32, i32, i32, i32
  }
  func.func @transform_4(%arg0: i32, %arg1: i32, %arg2: i32, %arg3: memref<4xi32, #tpu.memory_space<smem>>, %arg4: memref<4xi32, #tpu.memory_space<smem>>, %arg5: memref<4xi32, #tpu.memory_space<smem>>, %arg6: memref<4xi32, #tpu.memory_space<smem>>) -> (i32, i32, i32, i32) {
    %c4_i32 = arith.constant 4 : i32
    %0 = arith.muli %arg0, %c4_i32 : i32
    %1 = arith.addi %0, %arg1 : i32
    %c1_i32 = arith.constant 1 : i32
    %2 = arith.muli %1, %c1_i32 : i32
    %3 = arith.addi %2, %arg2 : i32
    %4 = arith.index_cast %3 : i32 to index
    %5 = memref.load %arg5[%4] : memref<4xi32, #tpu.memory_space<smem>>
    %6 = arith.index_cast %3 : i32 to index
    %7 = memref.load %arg6[%6] : memref<4xi32, #tpu.memory_space<smem>>
    %c0_i32 = arith.constant 0 : i32
    %c0_i32_0 = arith.constant 0 : i32
    %c0_i32_1 = arith.constant 0 : i32
    return %5, %7, %c0_i32, %c0_i32_0 : i32, i32, i32, i32
  }
  func.func @transform_5(%arg0: i32, %arg1: i32, %arg2: i32, %arg3: memref<4xi32, #tpu.memory_space<smem>>, %arg4: memref<4xi32, #tpu.memory_space<smem>>, %arg5: memref<4xi32, #tpu.memory_space<smem>>, %arg6: memref<4xi32, #tpu.memory_space<smem>>) -> (i32, i32) {
    %c0_i32 = arith.constant 0 : i32
    %c0_i32_0 = arith.constant 0 : i32
    return %arg0, %c0_i32 : i32, i32
  }
}

</mosaic_0001>

<bundles_post_ra>
// kernel: tpu_custom_call.1
= control target key start
LH: loop header
LB: loop body
LE: loop exit
PB: predicated region body
PF: predicated region fallthrough
CT: control target
= control target key end

     0   :  { %s1388_s15 = smov [#allocation3]   ;;  %s1389_s16 = smov [#allocation4]   ;;  %s1769_s0 = inlined_call_operand.hbm [shape: s32[4], index: 0, kind: input, shape index: {}]   ;;  %s1770_s4 = inlined_call_operand.hbm [shape: bf16[16,128], index: 4, kind: input, shape index: {}]   ;;  %s1771_s5 = inlined_call_operand.hbm [shape: f32[16,128], index: 5, kind: input, shape index: {}]   ;;  %s1772_s6 = inlined_call_operand.hbm [shape: f32[16,128], index: 6, kind: input, shape index: {}]   ;;  %s1773_s7 = inlined_call_operand.hbm [shape: bf16[4,1,128,128], index: 7, kind: input, shape index: {}]   ;;  %s1774_s8 = inlined_call_operand.hbm [shape: bf16[4,1,64,128], index: 8, kind: input, shape index: {}]   ;;  %s1775_s9 = inlined_call_operand.hbm [shape: f32[16,128], index: 9, kind: output, shape index: {}]   ;;  %s1776_s1 = inlined_call_operand.hbm [shape: s32[4], index: 1, kind: input, shape index: {}]   ;;  %s1777_s2 = inlined_call_operand.vmem [shape: s32[4], index: 2, kind: input, shape index: {}]   ;;  %s1778_s3 = inlined_call_operand.vmem [shape: s32[4], index: 3, kind: input, shape index: {}]  }
   0x1   :  { %1791 = sst [smem:[#allocation38_spill]] %s1770_s4  ;;  %s15_s11 = sshll.u32 %s1769_s0, 4  ;;  %s16_s11 = int_to_ptr.hbm [resolvable:$true] %s15_s11 }
   0x2   :  { %1792 = sst [smem:[#allocation39_spill]] %s1771_s5  ;;  %s20_s14 = sshll.u32 %s1776_s1, 4  ;;  %s21_s14 = int_to_ptr.hbm [resolvable:$true] %s20_s14 }
   0x3   :  { %1793 = sst [smem:[#allocation40_spill]] %s1772_s6  ;;  %s25_s19 = sshll.u32 %s1777_s2, 4  ;;  %s26_s19 = int_to_ptr.vmem [resolvable:$true] %s25_s19 }
   0x4   :  { %1794 = sst [smem:[#allocation41_spill]] %s1775_s9  ;;  %s30_s22 = sshll.u32 %s1778_s3, 4  ;;  %s31_s22 = int_to_ptr.vmem [resolvable:$true] %s30_s22 }
   0x5   :  { %18 = dma.hbm_to_smem %s16_s11, 16, %s1388_s15, [#allocation2] }
   0x6   :  { %23 = dma.hbm_to_smem %s21_s14, 16, %s1389_s16, [#allocation2] }
   0x7   :  { %s1390_s0 = smov [#allocation5]   ;;  %s1391_s23 = smov [#allocation6]  }
   0x8   :  { %28 = dma.vmem_to_smem %s26_s19, 16, %s1390_s0, [#allocation2] }
   0x9   :  { %33 = dma.vmem_to_smem %s31_s22, 16, %s1391_s23, [#allocation2] }
   0xa   :  { %1330 = dma.done.wait [#allocation2], 64 }
   0xb   :  { %1331 = vsyncadd [#allocation2], 4294967232 }
   0xc   :  { %36 = sfence }
   0xd   :  { %37 = vsyncpa [#allocation8], 0 }
   0xe   :  { %38 = vsyncpa [#allocation11], 0 }
   0xf   :  { %39 = vsyncpa [#allocation14], 0 }
  0x10   :  { %41 = vsyncpa [#allocation14 + $0x1], 0 }
  0x11   :  { %42 = vsyncpa [#allocation9], 0  ;;  %s1465_s1 = smov 0   ;;  %s1467_s2 = smov 0  }
  0x12   :  { %s1469_s24 = smov 0   ;;  %s1471_s3 = smov 0  }
  0x13   :  { %s1473_s25 = smov 0   ;;  %s1475_s26 = smov 0  }
  0x14   :  { %s1477_s27 = smov 0   ;;  %s1479_s28 = smov 0  }
  0x15   :  { %s1481_s29 = smov 0  }
  0x16 LB: > { %1795 = sst [smem:[#allocation31_spill]] %s1370_s25  ;;  %s1509_s30 = sadd.s32 4294967295, %s1386_s29   ;;  %s1386_s29 = sphi %s1481_s29, %s48_s29   ;;  %s1382_s28 = sphi %s1479_s28, %s1841_s28   ;;  %s1378_s27 = sphi %s1477_s27, %s1840_s27   ;;  %s1374_s26 = sphi %s1475_s26, %s1836_s26   ;;  %s1370_s25 = sphi %s1473_s25, %s1835_s25   ;;  %s1366_s3 = sphi %s1471_s3, %s1834_s3   ;;  %s1362_s24 = sphi %s1469_s24, %s1839_s24   ;;  %s1358_s2 = sphi %s1467_s2, %s1838_s2   ;;  %s1354_s1 = sphi %s1465_s1, %s1837_s1  }
  0x17   : > { %1796 = sst [smem:[#allocation32_spill]] %s1374_s26  ;;  %p215_p0 = scmp.ne.s32.totalorder %s1358_s2, %s1354_s1 }
  0x18   : > { %1797 = sst [smem:[#allocation33_spill]] %s1378_s27  ;;  %p1788_p1 = scmp.eq.s32.totalorder %s1509_s30, 0 }
  0x19   : > { %p817_p2 = scmp.ge.s32.totalorder %s1386_s29, 1  ;;  %p252_p3 = scmp.lt.s32.totalorder %s1386_s29, 5 }
  0x1a   : > { %p1517_p4 = por %p215_p0, %p1788_p1  ;;  %s1800_s5 = sld [smem:[#allocation39_spill]] }
  0x1b   : > { %p1524_p5 = pnand %p817_p2, %p252_p3  ;;  %s1392_s15 = smov [#allocation10]  }
  0x1c   : > { %s1798_s10 = scalar_select %p1517_p4, 1, 0 }
  0x1d   : > { %p939_p6 = pneg %p1524_p5  ;;  %s285_s16 = sshll.u32 %s1392_s15, 4  ;;  %s286_s16 = int_to_ptr.vmem [resolvable:$true] %s285_s16 }
  0x1e   : > { %1799 = sst [smem:[#allocation34_spill]] %s1798_s10  ;;  %p1789_p8 = scmp.lt.s32.totalorder %s1386_s29, 4 }
  0x1f   : > { %p1532_p7 = pnand %p939_p6, %p1788_p1  ;;  %s1779_s18 = smov 128  }
  0x20   : > { %s283_s13 = sshll.u32 %s1800_s5, 4  ;;  %s1780_s19 = smov 8   ;;  %s284_s13 = int_to_ptr.hbm [resolvable:$true] %s283_s13 }
  0x21   : > { %945 = dma.hbm_to_vmem [thread:$0]  (!%p1532_p7), %s284_s13, 256, %s286_s16, [#allocation11], %s1779_s18, %s1779_s18, %s1780_s19  }
  0x22   : > { %s63_s20 = sadd.s32 1, %s1382_s28  ;;  %s152_s21 = sld [smem:[#allocation5 + %s1382_s28]] }
  0x23   : > { %p65_p9 = scmp.ge.s32.totalorder %s63_s20, 4  ;;  %s153_s22 = sld [smem:[#allocation6 + %s1382_s28]] }
  0x24   : > { %s164_s0 = sadd.s32 1, %s1374_s26  ;;  %p171_p10 = scmp.ne.s32.totalorder %s1374_s26, %s1370_s25 }
  0x25   : > { %s1843_s20 = smov (%p65_p9, %s63_s20), 0  ;;  %p172_p11 = scmp.eq.s32.totalorder %s1386_s29, 0 }
  0x26   : > { %p177_p12 = scmp.ne.s32.totalorder %s1370_s25, %s1366_s3  ;;  %s157_s23 = sld [smem:[#allocation5 + %s1843_s20]] }
  0x27   : > { %s158_s1 = sld [smem:[#allocation6 + %s1843_s20]]  ;;  %p1557_p13 = por %p172_p11, %p171_p10 }
  0x28   : > { %p1563_p0 = por %p1788_p1, %p177_p12  ;;  %s318_s13 = sand.u32 1, %s1374_s26  }
  0x29   : > { %s822_s15 = sshll.u32 %s318_s13, 6  ;;  %p1573_p2 = pnand %p1789_p8, %p1557_p13 }
  0x2a   : > { %s1804_s12 = scalar_select %p1563_p0, 1, 0 }
  0x2b   : > { %s320_s19 = scalar_lea.vmem [#allocation13], %s822_s15  ;;  %s1809_s4 = sld [smem:[#allocation38_spill]] }
  0x2c   : > { %1805 = sst [smem:[#allocation35_spill]] %s1804_s12  ;;  %s159_s18 = ssub.s32 %s152_s21, %s157_s23 }
  0x2d   : > { %s1577_s5 = sshll.u32 %s320_s19, 4  ;;  %s160_s9 = ssub.s32 %s153_s22, %s158_s1 }
  0x2e   : > { %1807 = sst [smem:[#allocation36_spill]] %s1577_s5  ;;  %s161_s27 = sor.u32 %s160_s9, %s159_s18 }
  0x2f   : > { %p162_p3 = scmp.eq.s32.totalorder %s161_s27, 0  ;;  %s1395_s18 = smov [#allocation7]  }
  0x30   : > { %s917_s3 = scalar_select %p1557_p13, [#allocation5], [#allocation17] }
  0x31   : > { %s1583_s10 = scalar_select %p162_p3, %s1374_s26, %s164_s0  }
  0x32   : > { %s918_s13 = scalar_select %p1557_p13, %s1382_s28, 0 }
  0x33   : > { %1808 = sst [smem:[#allocation37_spill]] %s1583_s10  ;;  %s1845_s3 = smov (!%p1789_p8, %s917_s3), [#allocation21] }
  0x34   : > { %s1847_s13 = smov (!%p1789_p8, %s918_s13), 0  ;;  %s266_s9 = sshll.u32 %s1809_s4, 4  ;;  %s267_s9 = int_to_ptr.hbm [resolvable:$true] %s266_s9 }
  0x35   : > { %s919_s21 = scalar_select %p1557_p13, [#allocation6], [#allocation18] }
  0x36   : > { %s324_s19 = sld [smem:[%s1845_s3 + %s1847_s13]]  ;;  %s268_s0 = sshll.u32 %s1395_s18, 4  ;;  %s269_s0 = int_to_ptr.vmem [resolvable:$true] %s268_s0 }
  0x37   : > { %s1849_s21 = smov (!%p1789_p8, %s919_s21), [#allocation22]  ;;  %s1810_s6 = sld [smem:[#allocation40_spill]] }
  0x38   : > { %s325_s27 = sld [smem:[%s1849_s21 + %s1847_s13]]  ;;  %s1790_s3 = smov 64  }
  0x39   : > { %s1397_s22 = smov 4   ;;  %s1398_s13 = smov [#allocation12]  }
  0x3a   : > { %942 = dma.hbm_to_vmem [thread:$0]  (!%p1532_p7), %s267_s9, 128, %s269_s0, [#allocation8], %s1790_s3, %s1790_s3, %s1397_s22  }
  0x3b   : > { %s1609_s21 = sshll.u32 %s1398_s13, 4  ;;  %s190_s15 = sld [smem:[#allocation5 + %s1382_s28]]  ;;  %s303_s21 = int_to_ptr.vmem [resolvable:$true] %s1609_s21 }
  0x3c   : > { %s824_s11 = sshll.u32 %s324_s19, 4  ;;  %s191_s10 = sld [smem:[#allocation6 + %s1382_s28]] }
  0x3d   : > { %s300_s5 = sshll.u32 %s1810_s6, 4  ;;  %s195_s12 = sld [smem:[#allocation5 + %s1843_s20]]  ;;  %s1602_s5 = int_to_ptr.hbm [resolvable:$true] %s300_s5 }
  0x3e   : > { %s823_s23 = sshll.u32 %s325_s27, 4  ;;  %s196_s25 = sld [smem:[#allocation6 + %s1843_s20]] }
  0x3f   : > { %s330_s18 = sadd.s32 %s824_s11, %s823_s23  ;;  %s1811_s9 = sand.u32 1, %s1386_s29  }
  0x40   : > { %s825_s1 = sshll.u32 %s330_s18, 2  ;;  %s1621_s0 = scalar_lea.sflag [#allocation14], %s1811_s9 }
  0x41   : > { %s332_s6 = scalar_lea.hbm %s1773_s7, %s825_s1  ;;  %p1180_p9 = pneg %p1573_p2 }
  0x42   : > { %s333_s26 = sshll.u32 %s332_s6, 4  ;;  %s1183_s4 = scalar_lea.hbm %s1773_s7, 256  ;;  %s334_s26 = int_to_ptr.hbm [resolvable:$true] %s333_s26 }
  0x43   : > { %s1176_s13 = sshra.s32 %s334_s26, 4  ;;  %s1177_s13 = int_to_ptr.hbm [resolvable:$true] %s1176_s13 }
  0x44   : > { %s1178_s27 = scalar_lea.hbm %s1177_s13, 64  ;;  %p1184_p13 = scmp.lt.s32.totalorder %s1177_s13, %s1773_s7 }
  0x45   : > { %p1179_p6 = scmp.ne.s32.totalorder %s1177_s13, %s1178_s27  ;;  %p1185_p3 = scmp.lt.s32.totalorder %s1183_s4, %s1178_s27 }
  0x47   : > { %p1181_p10 = pnand %p1180_p9, %p1179_p6  ;;  %p1186_p1 = por %p1185_p3, %p1184_p13 }
  0x49   : > { %p1182_p12 = pneg %p1181_p10 }
  0x4b   : > { %p1187_p8 = pnand %p1186_p1, %p1182_p12 }
  0x4d   : > { %1190 = shalt.err (!%p1187_p8)
}
  0x4e   : > { %s1812_s1 = sld [smem:[#allocation36_spill]]  ;;  %s1814_s16 = smov 8  }
  0x4f   : > { %s1815_s9 = smov 128   ;;  %p209_p1 = scmp.ne.s32.totalorder %s1362_s24, %s1358_s2 }
  0x50   : > { %948 = dma.hbm_to_vmem [thread:$0]  (!%p1532_p7), %s1602_s5, 256, %s303_s21, [#allocation11], %s1815_s9, %s1815_s9, %s1814_s16  }
  0x51   : > { %s197_s13 = ssub.s32 %s190_s15, %s195_s12  ;;  %p1651_p8 = por %p209_p1, %p172_p11 }
  0x52   : > { %s202_s11 = sadd.s32 1, %s1362_s24  ;;  %p1817_p7 = scmp.lt.s32.totalorder %s1386_s29, 4 }
  0x53   : > { %s922_s23 = scalar_select %p1651_p8, [#allocation5], [#allocation19] }
  0x54   : > { %s1813_s19 = int_to_ptr.vmem [resolvable:$true] %s1812_s1  ;;  %p1818_p11 = pmov %p1817_p7 }
  0x55   : > { %956 = dma.hbm_to_vmem [thread:$0]  (!%p1573_p2), %s334_s26, 1024, %s1813_s19, %s1621_s0, %s1790_s3, %s1790_s3, %s1397_s22  }
  0x56   : > { %s198_s26 = ssub.s32 %s191_s10, %s196_s25  ;;  %s1851_s23 = smov (!%p1817_p7, %s922_s23), [#allocation23] }
  0x57   : > { %s199_s17 = sor.u32 %s198_s26, %s197_s13  ;;  %s347_s15 = sand.u32 1, %s1362_s24  }
  0x58   : > { %p200_p2 = scmp.eq.s32.totalorder %s199_s17, 0  ;;  %p1819_p6 = pmov %p1817_p7 }
  0x59   : > { %s923_s21 = scalar_select %p1651_p8, %s1382_s28, 0 }
  0x5a   : > { %s1659_s5 = scalar_select %p200_p2, %s1362_s24, %s202_s11  }
  0x5b   : > { %s1853_s21 = smov (!%p1818_p11, %s923_s21), 0  ;;  %p1820_p9 = pmov %p1819_p6 }
  0x5c   : > { %s924_s12 = scalar_select %p1651_p8, [#allocation6], [#allocation20] }
  0x5d   : > { %s353_s4 = sld [smem:[%s1851_s23 + %s1853_s21]]  ;;  %p1677_p10 = pnand %p1820_p9, %p1651_p8 }
  0x5e   : > { %s1855_s12 = smov (!%p1819_p6, %s924_s12), [#allocation24]  ;;  %s826_s10 = sshll.u32 %s347_s15, 5 }
  0x5f   : > { %s354_s18 = sld [smem:[%s1855_s12 + %s1853_s21]]  ;;  %s349_s19 = scalar_lea.vmem [#allocation15], %s826_s10 }
  0x60   : > { %s364_s16 = sshll.u32 %s349_s19, 4  ;;  %p1240_p13 = pneg %p1677_p10  ;;  %s365_s16 = int_to_ptr.vmem [resolvable:$true] %s364_s16 }
  0x61   : > { %s1243_s15 = scalar_lea.hbm %s1774_s8, 128 }
  0x63   : > { %s828_s6 = sshll.u32 %s353_s4, 3 }
  0x65   : > { %s827_s1 = sshll.u32 %s354_s18, 3 }
  0x66   : > { %s359_s9 = sadd.s32 %s828_s6, %s827_s1 }
  0x67   : > { %s829_s13 = sshll.u32 %s359_s9, 2 }
  0x68   : > { %s361_s11 = scalar_lea.hbm %s1774_s8, %s829_s13 }
  0x69   : > { %s362_s27 = sshll.u32 %s361_s11, 4  ;;  %s363_s27 = int_to_ptr.hbm [resolvable:$true] %s362_s27 }
  0x6a   : > { %s1236_s23 = sshra.s32 %s363_s27, 4  ;;  %s1237_s23 = int_to_ptr.hbm [resolvable:$true] %s1236_s23 }
  0x6b   : > { %s1238_s3 = scalar_lea.hbm %s1237_s23, 32  ;;  %p1244_p8 = scmp.lt.s32.totalorder %s1237_s23, %s1774_s8 }
  0x6c   : > { %p1239_p12 = scmp.ne.s32.totalorder %s1237_s23, %s1238_s3  ;;  %p1245_p2 = scmp.lt.s32.totalorder %s1243_s15, %s1238_s3 }
  0x6e   : > { %p1241_p3 = pnand %p1240_p13, %p1239_p12  ;;  %p1246_p7 = por %p1245_p2, %p1244_p8 }
  0x70   : > { %p1242_p1 = pneg %p1241_p3 }
  0x72   : > { %p1247_p11 = pnand %p1246_p7, %p1242_p1 }
  0x74   : > { %1250 = shalt.err (!%p1247_p11)
}
  0x75   : > { %s1822_s18 = smov 64   ;;  %376 = sbr.rel (%p1524_p5) target bundleno = 606 (0x25e), region = 40 }
  0x76   : > { %963 = dma.hbm_to_vmem [thread:$0]  (!%p1677_p10), %s363_s27, 512, %s365_s16, %s1621_s0, %s1822_s18, %s1822_s18, %s1397_s22  }
  0x77   : > { %p1823_p6 = scmp.eq.s32.totalorder (!%p1524_p5), %s1509_s30, 0 }
  0x7a   : > { %1333 = dma.done.wait (%p1823_p6), [#allocation8], 128   ;;  %p1824_p9 = pmov %p1823_p6 }
  0x7b   : > { %p1825_p12 = pmov %p1823_p6 }
  0x7c   : > { %1335 = vsyncadd (%p1824_p9), [#allocation8], 4294967168 }
  0x7d   : > { %1337 = dma.done.wait (%p1825_p12), [#allocation11], 512   ;;  %p1826_p13 = pmov %p1823_p6 }
  0x7e   : > { %s1827_s3 = sld [smem:[#allocation31_spill]]  ;;  %s393_s6 = sand.u32 1, %s1509_s30  }
  0x7f   : > { %1339 = vsyncadd (%p1826_p13), [#allocation11], 4294966784  ;;  %s394_s14 = scalar_lea.sflag [#allocation14], %s393_s6 }
  0x84   : > { %s395_s22 = sand.u32 1, %s1827_s3  }
  0x85   : > { %s834_s0 = sshll.u32 %s395_s22, 6 }
  0x86   : > { %s1710_s1 = scalar_lea.vmem [#allocation13], %s834_s0 }
  0x87   : > { %1341 = dma.done.wait (%p1563_p0), %s394_s14, 1024  }
  0x88   : > { %1343 = vsyncadd (%p1563_p0), %s394_s14, 4294966272  ;;  %s405_s16 = sand.u32 1, %s1358_s2  }
  0x89   : > { %s835_s9 = sshll.u32 %s405_s16, 5 }
  0x8a   : > { %s1717_s13 = scalar_lea.vmem [#allocation15], %s835_s9 }
  0x8b   : > { %1345 = dma.done.wait (%p1517_p4), %s394_s14, 512  }
  0x8c   : > { %1347 = vsyncadd (%p1517_p4), %s394_s14, 4294966784  ;;  %s1830_s26 = sld [smem:[#allocation33_spill]] }
  0x92   : > { %p450_p5 = scmp.eq.s32.totalorder %s1830_s26, 0 }
  0x93   : > { %v456_v0 = vld [vmem:[#allocation10] sm:$0xff] (%p450_p5)  ;;  %v457_v1 = vld [vmem:[#allocation10 + $0x8] sm:$0xff] (%p450_p5) }
  0x94   : > { %455 = sbr.rel (!%p450_p5) target bundleno = 153 (0x99), region = 64  ;;  %458 = vst [vmem:[#allocation16] sm:$0xff] (%p450_p5), %v456_v0 }
  0x95   : > { %459 = vst [vmem:[#allocation16 + $0x8] sm:$0xff] (%p450_p5), %v457_v1 }
  0x99 PF: > { %s1831_s17 = sld [smem:[#allocation33_spill]] }
  0x9f   : > { %s462_s11 = sld [smem:[#allocation4 + %s1831_s17]] }
  0xa5   : > { %p837_p0 = scmp.le.s32.totalorder %s462_s11, 0 }
  0xa6   : > { %s1832_s27 = sld [smem:[#allocation33_spill]] (!%p837_p0)  ;;  %s1399_s21 = smov (!%p837_p0), 64  }
  0xa7   : > { %466 = sbr.rel (%p837_p0) target bundleno = 596 (0x254), region = 68 }
  0xac   : > { %v906_v2 = vld [vmem:[%s1710_s1 + $0x38] sm:$0xff]  ;;  %v905_v3 = vld [vmem:[%s1710_s1 + $0x30] sm:$0xff]  ;;  %v904_v4 = vld [vmem:[%s1710_s1 + $0x28] sm:$0xff]  ;;  %s467_s23 = sld [smem:[#allocation3 + %s1832_s27]]  ;;  %v604_v11 = vlaneseq  ;;  %vm653_vm9 = vcmask 523264  }
  0xad   : > { %540 = vmatpush.bf16.msra.mxu0 %v906_v2  ;;  %v903_v5 = vld [vmem:[%s1710_s1 + $0x20] sm:$0xff]  ;;  %v902_v6 = vld [vmem:[%s1710_s1 + $0x18] sm:$0xff]  ;;  %v901_v7 = vld [vmem:[%s1710_s1 + $0x10] sm:$0xff] }
  0xae   : > { %v900_v8 = vld [vmem:[%s1710_s1 + $0x8] sm:$0xff]  ;;  %v899_v9 = vld [vmem:[%s1710_s1] sm:$0xff]  ;;  %v898_v10 = vld [vmem:[#allocation7] sm:$0xff]  ;;  %v605_v12 = vand.u32 127, %v604_v11 }
  0xaf   : > { %v608_v14 = vld [vmem:[#allocation12] sm:$0xff]  ;;  %v609_v16 = vld [vmem:[#allocation12 + $0x8] sm:$0xff]  ;;  %v908_v28 = vld [vmem:[%s1717_s13 + $0x8] sm:$0xff] }
  0xb0   : > { %v910_v19 = vld [vmem:[%s1717_s13 + $0x18] sm:$0xff]  ;;  %v909_v26 = vld [vmem:[%s1717_s13 + $0x10] sm:$0xff]  ;;  %v907_v29 = vld [vmem:[%s1717_s13] sm:$0xff] }
  0xb1   : > { %541 = vmatpush.bf16.msra.mxu0 %v905_v3  ;;  %661 = vmatpush.bf16.msra.mxu1 %v910_v19  ;;  %v619_v61 = vld [vmem:[#allocation16] sm:$0xff]  ;;  %v620_v0 = vld [vmem:[#allocation16 + $0x8] sm:$0xff] }
  0xb2   : > { %v606_v13 = vstv %s467_s23 }
  0xb3   : > { %vm607_vm0 = vcmp.eq.s32.totalorder %v605_v12, %v606_v13 }
  0xb4   : > { %v610_v15 = vsel %vm607_vm0, %v608_v14, 0.0  ;;  %v611_v17 = vsel %vm607_vm0, %v609_v16, 0.0 }
  0xb5   : > { %542 = vmatpush.bf16.msra.mxu0 %v904_v4  ;;  %612 = vadd.xlane.f32.xlu1 %v610_v15 }
  0xb6   : > { %662 = vmatpush.bf16.msra.mxu1 %v909_v26 }
  0xb9   : > { %543 = vmatpush.bf16.msra.mxu0 %v903_v5 }
  0xba   : > { %663 = vmatpush.bf16.msra.mxu1 %v908_v28 }
  0xbd   : > { %544 = vmatpush.bf16.msra.mxu0 %v902_v6  ;;  %614 = vadd.xlane.f32.xlu1 %v611_v17 }
  0xbe   : > { %664 = vmatpush.bf16.msra.mxu1 %v907_v29 }
  0xc1   : > { %545 = vmatpush.bf16.msra.mxu0 %v901_v7 }
  0xc5   : > { %546 = vmatpush.bf16.msra.mxu0 %v900_v8 }
  0xc9   : > { %547 = vmatpush.bf16.msra.mxu0 %v899_v9 }
  0xcc   : > { %548 = vmatmul.bf16.vlgmr.msra.gmra.mxu0 %v898_v10 }
 0x128   : > { %v613_v43 = vpop.xlane.xlu1 %612 }
 0x130   : > { %v615_v56 = vpop.xlane.xlu1 %614 }
 0x149   : > { %v549_v18 = vpop.f32.mrf.mxu0 }
 0x14a   : > { %596 = vrot.lane.b32.xlu0 %v549_v18, %s1399_s21  ;;  %v874_v21 = vmul.f32 -1.442695, %v549_v18 }
 0x14c   : > { %1060 = vpow2.f32 %v874_v21 }
 0x151   : > { %v551_v20 = vpop.f32.mrf.mxu0 }
 0x152   : > { %598 = vrot.lane.b32.xlu0 %v551_v20, %s1399_s21  ;;  %v875_v22 = vmul.f32 -1.442695, %v551_v20  ;;  %v1061_v23 = vpop.eup %1060 }
 0x153   : > { %v560_v25 = vadd.f32 1.0, %v1061_v23 }
 0x154   : > { %1062 = vpow2.f32 %v875_v22 }
 0x155   : > { %1064 = vrcp.f32 %v560_v25  ;;  %v573_v39 = vand.u32 2147483648, %v560_v25  ;;  %vm567_vm3 = vweird.f32 %v560_v25  ;;  %v571_v41 = vand.u32 2147483647, %v560_v25 }
 0x157   : > { %v574_v47 = vor.u32 1.1754944e-38, %v573_v39  ;;  %vm572_vm7 = vcmp.eq.f32.partialorder %v571_v41, 8.507059e+37 }
 0x15a   : > { %v1063_v24 = vpop.eup %1062 }
 0x15b   : > { %v561_v27 = vadd.f32 1.0, %v1063_v24  ;;  %v1065_v30 = vpop.eup %1064 }
 0x15c   : > { %v563_v32 = vmul.f32 %v1065_v30, %v560_v25  ;;  %vm568_vm1 = vweird.f32 %v1065_v30 }
 0x15d   : > { %1066 = vrcp.f32 %v561_v27  ;;  %v588_v42 = vand.u32 2147483648, %v561_v27  ;;  %vm569_vm4 = vmor %vm567_vm3, %vm568_vm1  ;;  %vm582_vm5 = vweird.f32 %v561_v27  ;;  %v586_v44 = vand.u32 2147483647, %v561_v27 }
 0x15e   : > { %v564_v34 = vsub.f32 1.0, %v563_v32 }
 0x15f   : > { %v589_v49 = vor.u32 1.1754944e-38, %v588_v42  ;;  %vm587_vm8 = vcmp.eq.f32.partialorder %v586_v44, 8.507059e+37 }
 0x160   : > { %v565_v36 = vmul.f32 %v1065_v30, %v564_v34 }
 0x162   : > { %v566_v38 = vadd.f32 %v1065_v30, %v565_v36 }
 0x163   : > { %v1067_v31 = vpop.eup %1066 }
 0x164   : > { %v578_v33 = vmul.f32 %v1067_v31, %v561_v27  ;;  %vm583_vm2 = vweird.f32 %v1067_v31  ;;  %v570_v45 = vsel %vm569_vm4, %v1065_v30, %v566_v38 }
 0x165   : > { %vm584_vm6 = vmor %vm582_vm5, %vm583_vm2  ;;  %v575_v50 = vsel %vm572_vm7, %v574_v47, %v570_v45 }
 0x166   : > { %v579_v35 = vsub.f32 1.0, %v578_v33  ;;  %v592_v52 = vmul.f32 %v575_v50, %v549_v18 }
 0x168   : > { %v580_v37 = vmul.f32 %v1067_v31, %v579_v35 }
 0x16a   : > { %v581_v40 = vadd.f32 %v1067_v31, %v580_v37 }
 0x16c   : > { %v585_v48 = vsel %vm584_vm6, %v1067_v31, %v581_v40 }
 0x16d   : > { %v590_v51 = vsel %vm587_vm8, %v589_v49, %v585_v48 }
 0x16e   : > { %v593_v53 = vmul.f32 %v590_v51, %v551_v20 }
 0x1bc   : > { %v597_v46 = vpop.permute.xlu0 %596 }
 0x1bd   : > { %v602_v54 = vmul.f32 %v597_v46, %v592_v52 }
 0x1bf   : > { %v616_v58 = vmul.f32 %v613_v43, %v602_v54 }
 0x1c4   : > { %v599_v55 = vpop.permute.xlu0 %598 }
 0x1c5   : > { %v603_v57 = vmul.f32 %v599_v55, %v593_v53 }
 0x1c7   : > { %v617_v59 = vmul.f32 %v615_v56, %v603_v57 }
 0x1c9   : > { %v618_v60 = vpack.c.bf16 %v617_v59, %v616_v58 }
 0x1cb   : > { %892 = vmatmul.msk.bf16.vlgmr.msra.gmra.mxu1 %vm653_vm9, %v618_v60 }
 0x248   : > { %v666_v62 = vpop.f32.mrf.mxu1 }
 0x249   : > { %v671_v63 = vadd.f32 %v666_v62, %v619_v61 }
 0x24b   : > { %673 = vst [vmem:[#allocation16] sm:$0xff] %v671_v63 }
 0x250   : > { %v668_v1 = vpop.f32.mrf.mxu1 }
 0x251   : > { %v672_v2 = vadd.f32 %v668_v1, %v620_v0 }
 0x253   : > { %674 = vst [vmem:[#allocation16 + $0x8] sm:$0xff] %v672_v2 }
 0x254 PF: > { %p971_p4 = scmp.eq.s32.totalorder %s1509_s30, 3  ;;  %s1833_s4 = sld [smem:[#allocation41_spill]] }
 0x255   : > { %s1400_s18 = smov [#allocation16]   ;;  %s1401_s25 = smov 128  }
 0x256   : > { %s683_s3 = sshll.u32 %s1400_s18, 4  ;;  %s1402_s6 = smov 8   ;;  %s684_s3 = int_to_ptr.vmem [resolvable:$true] %s683_s3 }
 0x25a   : > { %s685_s10 = sshll.u32 %s1833_s4, 4  ;;  %s686_s10 = int_to_ptr.hbm [resolvable:$true] %s685_s10 }
 0x25b   : > { %936 = dma.vmem_to_hbm [thread:$0]  (%p971_p4), %s684_s3, 256, %s686_s10, [#allocation9], %s1401_s25, %s1401_s25, %s1402_s6  }
 0x25c   : > { %1349 = dma.done.wait (%p971_p4), [#allocation9], 256  }
 0x25d   : > { %1351 = vsyncadd (%p971_p4), [#allocation9], 4294967040 }
 0x25e PF: > { %s48_s29 = sadd.s32 1, %s1386_s29   ;;  %s1834_s3 = sld [smem:[#allocation31_spill]] }
 0x25f   : > { %p45_p10 = scmp.ge.s32.totalorder %s48_s29, 6   ;;  %s1835_s25 = sld [smem:[#allocation32_spill]] }
 0x260   : > { %s1836_s26 = sld [smem:[#allocation37_spill]]  ;;  %s1837_s1 = smov %s1358_s2 }
 0x261   : > { %s1838_s2 = smov %s1362_s24  ;;  %s1839_s24 = smov %s1659_s5 }
 0x262   : > { %s1840_s27 = smov %s1382_s28  ;;  %s1841_s28 = smov %s1843_s20 }
 0x263   :  { %47 = sbr.rel (!%p45_p10) target bundleno = 22 (0x16), region = 113 }
 0x268   :  { %702 = vsyncpa [#allocation8], 1 }
 0x269   :  { %704 = vsyncpa [#allocation8 + $0x1], 1 }
 0x26a   :  { %705 = vsyncpa [#allocation11], 1 }
 0x26b   :  { %706 = vsyncpa [#allocation14], 1 }
 0x26c   :  { %708 = vsyncpa [#allocation14 + $0x1], 1 }
 0x26d   :  { %709 = vsyncpa [#allocation9], 1 }
 0x26e   :  { %711 = vsyncpa [#allocation9 + $0x1], 1 }

</bundles_post_ra>
